<compile_context>
chip_gen: v6e
topology: v6e:2x2x1
jax: 0.10.0
libtpu: 0.0.40
codegen_flags: <defaults>
</compile_context>

<pallas_src>
import functools

import jax
import jax.numpy as jnp
from jax import lax
from jax.experimental import pallas as pl
from jax.experimental.pallas import tpu as pltpu


def _bert_embeddings_kernel(ids_ref, tt_ref, word_hbm, pos_ref, type_ref,
                            gamma_ref, beta_ref, o_ref, gbuf, sem, *,
                            seq_len, eps):
    # ids_ref  : [B*S] int32, SMEM (scalar prefetch, row-major flattened)
    # tt_ref   : [St, 1] int32, VMEM tile of token_type ids for this step
    # word_hbm : [V, H] in HBM (pl.ANY) -- gathered row-by-row via DMA
    # pos_ref  : [St, H] rows j*St .. j*St+St-1 of the position table
    # type_ref : [T, H] (tiny, VMEM resident)
    # gamma_ref, beta_ref : [1, H]
    # o_ref    : [1, St, H] output block for (batch b, seq tile j)
    # gbuf     : VMEM [St, H] gather buffer (word rows of this tile)
    # sem      : DMA semaphore shared by the St row copies of this tile
    b = pl.program_id(0)
    j = pl.program_id(1)
    V = word_hbm.shape[0]
    St, H = pos_ref.shape
    T = type_ref.shape[0]

    base = b * seq_len + j * St

    # ---- word embedding: per-token row DMA gather from the HBM table ------
    @pl.loop(0, St)
    def _(t):
        tok = jnp.clip(ids_ref[base + t], 0, V - 1)   # guard untrusted ids
        pltpu.make_async_copy(word_hbm.at[pl.ds(tok, 1), :],
                              gbuf.at[pl.ds(t, 1), :], sem).start()

    @pl.loop(0, St)
    def _(t):
        # All row copies are identically sized; drain the shared semaphore.
        pltpu.make_async_copy(word_hbm.at[pl.ds(0, 1), :],
                              gbuf.at[pl.ds(0, 1), :], sem).wait()

    word_vec = gbuf[...].astype(jnp.float32)            # [St, H]
    pos_vec = pos_ref[...].astype(jnp.float32)          # [St, H]

    # ---- token-type embedding: VPU select over the tiny type table --------
    tt = tt_ref[...]                                     # [St, 1] int32
    type_vec = jnp.broadcast_to(
        type_ref[pl.ds(0, 1), :].astype(jnp.float32), (St, H))
    for t in range(1, T):                                # T is tiny (usually 2)
        type_vec = jnp.where(tt == t,
                             type_ref[pl.ds(t, 1), :].astype(jnp.float32),
                             type_vec)

    e = word_vec + pos_vec + type_vec                    # [St, H] f32

    # ---- LayerNorm over H: two independent reductions, all f32 ------------
    inv_h = jnp.float32(1.0 / H)
    s1 = jnp.sum(e, axis=-1, keepdims=True)
    s2 = jnp.sum(e * e, axis=-1, keepdims=True)
    mu = s1 * inv_h
    var = s2 * inv_h - mu * mu
    inv = lax.rsqrt(var + eps)
    y = (e - mu) * inv * gamma_ref[...].astype(jnp.float32) \
        + beta_ref[...].astype(jnp.float32)

    # TODO(synk): dropout omitted (eval/inference path); training-mode dropout
    # would use pltpu.prng_seed + pltpu.stateful_bernoulli.
    o_ref[0] = y.astype(o_ref.dtype)


def bert_embeddings(input_ids, token_type_ids, word_table, pos_table,
                    type_table, ln_gamma, ln_beta, *, eps=1e-12, seq_tile=None):
    """BertEmbeddings forward (default position_ids = arange(S), eval mode).

    input_ids, token_type_ids: [B, S] int32
    word_table: [V, H], pos_table: [P, H] (P >= S), type_table: [T, H]
    ln_gamma, ln_beta: [H]
    Returns [B, S, H] in word_table.dtype.
    """
    B, S = input_ids.shape
    V, H = word_table.shape
    P = pos_table.shape[0]
    T = type_table.shape[0]
    assert P >= S, "max_position_embeddings must cover the sequence length"
    assert H % 128 == 0, "hidden size must be lane-dense (768/1024 in BERT)"

    if seq_tile is None:
        seq_tile = min(S, 512)
    St = int(seq_tile)
    assert S % St == 0 and St % 8 == 0
    n_seq_tiles = S // St

    ids_flat = input_ids.reshape(B * S).astype(jnp.int32)
    tt_col = token_type_ids.reshape(B * S, 1).astype(jnp.int32)
    gamma2d = ln_gamma.reshape(1, H)
    beta2d = ln_beta.reshape(1, H)

    # NOTE: on v6e/v7x, casting the embedding tables to bf16 at this boundary
    # halves HBM traffic; the gather DMA and f32 LayerNorm stay exact.  Kept in
    # the caller's dtype so the demo matches the f32 reference.

    kernel = functools.partial(_bert_embeddings_kernel,
                               seq_len=S, eps=float(eps))

    return pl.pallas_call(
        kernel,
        out_shape=jax.ShapeDtypeStruct((B, S, H), word_table.dtype),
        grid_spec=pltpu.PrefetchScalarGridSpec(
            num_scalar_prefetch=1,            # input_ids -> SMEM
            grid=(B, n_seq_tiles),
            in_specs=[
                # token_type ids for this tile as a [St, 1] column.
                pl.BlockSpec((St, 1), lambda b, j, ids: (b * n_seq_tiles + j, 0)),
                # word table stays in HBM; gathered manually in the kernel.
                pl.BlockSpec(memory_space=pl.ANY),
                # position rows of this seq tile (auto-pipelined).
                pl.BlockSpec((St, H), lambda b, j, ids: (j, 0)),
                # tiny resident tables / LN params (constant index maps).
                pl.BlockSpec((T, H), lambda b, j, ids: (0, 0)),
                pl.BlockSpec((1, H), lambda b, j, ids: (0, 0)),
                pl.BlockSpec((1, H), lambda b, j, ids: (0, 0)),
            ],
            out_specs=pl.BlockSpec((1, St, H), lambda b, j, ids: (b, j, 0)),
            scratch_shapes=[
                pltpu.VMEM((St, H), word_table.dtype),   # word-row gather buf
                pltpu.SemaphoreType.DMA,                 # shared row-DMA sem
            ],
        ),
        compiler_params=pltpu.CompilerParams(
            dimension_semantics=("parallel", "parallel"),
        ),
    )(ids_flat, tt_col, word_table, pos_table, type_table, gamma2d, beta2d)


if __name__ == "__main__":
    # Small BERT-like config: batch=2, seq=16, hidden=128 (lane-dense),
    # vocab=64, max_position=32, type_vocab=2.  seq_tile=8 -> grid (2, 2).
    B, S, H = 2, 16, 128
    V, P, T = 64, 32, 2
    eps = 1e-12

    key = jax.random.PRNGKey(0)
    k_ids, k_tt, k_w, k_p, k_t, k_g, k_b = jax.random.split(key, 7)

    input_ids = jax.random.randint(k_ids, (B, S), 0, V, dtype=jnp.int32)
    token_type_ids = jax.random.randint(k_tt, (B, S), 0, T, dtype=jnp.int32)

    word_table = 0.02 * jax.random.normal(k_w, (V, H), dtype=jnp.float32)
    pos_table = 0.02 * jax.random.normal(k_p, (P, H), dtype=jnp.float32)
    type_table = 0.02 * jax.random.normal(k_t, (T, H), dtype=jnp.float32)
    ln_gamma = 1.0 + 0.1 * jax.random.normal(k_g, (H,), dtype=jnp.float32)
    ln_beta = 0.1 * jax.random.normal(k_b, (H,), dtype=jnp.float32)

    out = bert_embeddings(input_ids, token_type_ids, word_table, pos_table,
                          type_table, ln_gamma, ln_beta, eps=eps, seq_tile=8)
    out = jax.block_until_ready(out)

    # Plain-JAX reference matching the PyTorch forward (eval mode, default
    # position_ids, dropout as identity).
    e = (word_table[input_ids]
         + pos_table[:S][None, :, :]
         + type_table[token_type_ids])
    mu = e.mean(-1, keepdims=True)
    var = ((e - mu) ** 2).mean(-1, keepdims=True)
    ref = (e - mu) / jnp.sqrt(var + eps) * ln_gamma + ln_beta

    assert out.shape == (B, S, H)
    assert jnp.allclose(out, ref, atol=2e-5, rtol=2e-5), (
        float(jnp.max(jnp.abs(out - ref))))

    print("KERNEL_OK")
</pallas_src>

<mosaic_0001>
module attributes {stable_mosaic.version = 11 : i64} {
  func.func @_bert_embeddings_kernel(%arg0: i32, %arg1: i32, %arg2: memref<32xi32, #tpu.memory_space<smem>>, %arg3: memref<8x1xi32, #tpu.memory_space<vmem>>, %arg4: memref<64x128xf32, #tpu.memory_space<any>>, %arg5: memref<8x128xf32, #tpu.memory_space<vmem>>, %arg6: memref<2x128xf32, #tpu.memory_space<vmem>>, %arg7: memref<1x128xf32, #tpu.memory_space<vmem>>, %arg8: memref<1x128xf32, #tpu.memory_space<vmem>>, %arg9: memref<1x8x128xf32, #tpu.memory_space<vmem>>, %arg10: memref<8x128xf32, #tpu.memory_space<vmem>>, %arg11: memref<!tpu.dma_semaphore, #tpu.memory_space<semaphore_mem>>) attributes {dimension_semantics = [#tpu.dimension_semantics<parallel>, #tpu.dimension_semantics<parallel>], iteration_bounds = array<i64: 2, 2>, scalar_prefetch = 1 : i64, scratch_operands = 2 : i64, tpu.core_type = #tpu.core_type<tc>, window_params = [{transform_indices = @transform_0, window_bounds = array<i64: 8, 1>}, {}, {transform_indices = @transform_2, window_bounds = array<i64: 8, 128>}, {pipeline_mode = #tpu.pipeline_mode<synchronous>, transform_indices = @transform_3, window_bounds = array<i64: 2, 128>}, {pipeline_mode = #tpu.pipeline_mode<synchronous>, transform_indices = @transform_4, window_bounds = array<i64: 1, 128>}, {pipeline_mode = #tpu.pipeline_mode<synchronous>, transform_indices = @transform_5, window_bounds = array<i64: 1, 128>}, {transform_indices = @transform_6, window_bounds = array<i64: 1, 8, 128>}]} {
    %c16_i32 = arith.constant 16 : i32
    %0 = arith.muli %arg0, %c16_i32 : i32
    %c8_i32 = arith.constant 8 : i32
    %1 = arith.muli %arg1, %c8_i32 : i32
    %2 = arith.addi %0, %1 : i32
    %c0_i32 = arith.constant 0 : i32
    %c8_i32_0 = arith.constant 8 : i32
    %3 = arith.addi %c0_i32, %c8_i32_0 : i32
    %c1_i32 = arith.constant 1 : i32
    scf.for %arg12 = %c0_i32 to %3 step %c1_i32  : i32 {
      %c1_i32_25 = arith.constant 1 : i32
      %48 = arith.muli %arg12, %c1_i32_25 : i32
      %c0_i32_26 = arith.constant 0 : i32
      %49 = arith.addi %c0_i32_26, %48 : i32
      %50 = arith.addi %2, %49 : i32
      %51 = arith.index_cast %50 : i32 to index
      %52 = memref.load %arg2[%51] : memref<32xi32, #tpu.memory_space<smem>>
      %c0_i32_27 = arith.constant 0 : i32
      %c63_i32 = arith.constant 63 : i32
      %53 = arith.maxsi %c0_i32_27, %52 : i32
      %54 = arith.minsi %c63_i32, %53 : i32
      %c0_i32_28 = arith.constant 0 : i32
      %55 = tpu.memref_slice %arg4[%54, %c0_i32_28] : memref<64x128xf32, #tpu.memory_space<any>> -> memref<1x128xf32, #tpu.memory_space<any>>
      %c0_i32_29 = arith.constant 0 : i32
      %56 = tpu.memref_slice %arg10[%49, %c0_i32_29] : memref<8x128xf32, #tpu.memory_space<vmem>> -> memref<1x128xf32, #tpu.memory_space<vmem>>
      tpu.enqueue_dma source(%55 : memref<1x128xf32, #tpu.memory_space<any>>) target(%56 : memref<1x128xf32, #tpu.memory_space<vmem>>) target_semaphore(%arg11 : memref<!tpu.dma_semaphore, #tpu.memory_space<semaphore_mem>>)
    }
    %c8_i32_1 = arith.constant 8 : i32
    %c0_i32_2 = arith.constant 0 : i32
    %c8_i32_3 = arith.constant 8 : i32
    %4 = arith.addi %c0_i32_2, %c8_i32_3 : i32
    %c1_i32_4 = arith.constant 1 : i32
    scf.for %arg12 = %c0_i32_2 to %4 step %c1_i32_4  : i32 {
      %c0_i32_25 = arith.constant 0 : i32
      %c0_i32_26 = arith.constant 0 : i32
      %48 = tpu.memref_slice %arg4[%c0_i32_25, %c0_i32_26] : memref<64x128xf32, #tpu.memory_space<any>> -> memref<1x128xf32, #tpu.memory_space<any>>
      %c0_i32_27 = arith.constant 0 : i32
      %c0_i32_28 = arith.constant 0 : i32
      %49 = tpu.memref_slice %arg10[%c0_i32_27, %c0_i32_28] : memref<8x128xf32, #tpu.memory_space<vmem>> -> memref<1x128xf32, #tpu.memory_space<vmem>>
      tpu.wait_dma2 semaphore(%arg11 : memref<!tpu.dma_semaphore, #tpu.memory_space<semaphore_mem>>) src(%48 : memref<1x128xf32, #tpu.memory_space<any>>) dst(%49 : memref<1x128xf32, #tpu.memory_space<vmem>>)
    }
    %c0 = arith.constant 0 : index
    %c0_5 = arith.constant 0 : index
    %5 = vector.load %arg10[%c0, %c0_5] : memref<8x128xf32, #tpu.memory_space<vmem>>, vector<8x128xf32>
    %c0_6 = arith.constant 0 : index
    %c0_7 = arith.constant 0 : index
    %6 = vector.load %arg5[%c0_6, %c0_7] : memref<8x128xf32, #tpu.memory_space<vmem>>, vector<8x128xf32>
    %c0_8 = arith.constant 0 : index
    %c0_9 = arith.constant 0 : index
    %7 = vector.load %arg3[%c0_8, %c0_9] : memref<8x1xi32, #tpu.memory_space<vmem>>, vector<8x1xi32>
    %c0_10 = arith.constant 0 : index
    %c0_11 = arith.constant 0 : index
    %8 = vector.load %arg6[%c0_10, %c0_11] : memref<2x128xf32, #tpu.memory_space<vmem>>, vector<1x128xf32>
    %9 = vector.shape_cast %8 : vector<1x128xf32> to vector<1x128xf32>
    %10 = vector.broadcast %9 : vector<1x128xf32> to vector<8x128xf32>
    %c1_i32_12 = arith.constant 1 : i32
    %11 = vector.broadcast %c1_i32_12 : i32 to vector<8x1xi32>
    %12 = arith.cmpi eq, %7, %11 : vector<8x1xi32>
    %c1 = arith.constant 1 : index
    %c0_13 = arith.constant 0 : index
    %13 = vector.load %arg6[%c1, %c0_13] : memref<2x128xf32, #tpu.memory_space<vmem>>, vector<1x128xf32>
    %14 = vector.shape_cast %12 : vector<8x1xi1> to vector<8x1xi1>
    %15 = vector.broadcast %14 : vector<8x1xi1> to vector<8x128xi1>
    %16 = vector.shape_cast %13 : vector<1x128xf32> to vector<1x128xf32>
    %17 = vector.broadcast %16 : vector<1x128xf32> to vector<8x128xf32>
    %18 = arith.select %15, %17, %10 : vector<8x128xi1>, vector<8x128xf32>
    %19 = arith.addf %5, %6 : vector<8x128xf32>
    %20 = arith.addf %19, %18 : vector<8x128xf32>
    %cst = arith.constant dense<0.000000e+00> : vector<8xf32>
    %21 = vector.multi_reduction <add>, %20, %cst [1] : vector<8x128xf32> to vector<8xf32>
    %22 = vector.shape_cast %21 : vector<8xf32> to vector<8x1xf32>
    %23 = arith.mulf %20, %20 : vector<8x128xf32>
    %cst_14 = arith.constant dense<0.000000e+00> : vector<8xf32>
    %24 = vector.multi_reduction <add>, %23, %cst_14 [1] : vector<8x128xf32> to vector<8xf32>
    %25 = vector.shape_cast %24 : vector<8xf32> to vector<8x1xf32>
    %cst_15 = arith.constant 7.812500e-03 : f32
    %26 = vector.broadcast %cst_15 : f32 to vector<8x1xf32>
    %27 = arith.mulf %22, %26 : vector<8x1xf32>
    %cst_16 = arith.constant 7.812500e-03 : f32
    %28 = vector.broadcast %cst_16 : f32 to vector<8x1xf32>
    %29 = arith.mulf %25, %28 : vector<8x1xf32>
    %30 = arith.mulf %27, %27 : vector<8x1xf32>
    %31 = arith.subf %29, %30 : vector<8x1xf32>
    %cst_17 = arith.constant 9.99999996E-13 : f32
    %32 = vector.broadcast %cst_17 : f32 to vector<8x1xf32>
    %33 = arith.addf %31, %32 : vector<8x1xf32>
    %34 = math.rsqrt %33 : vector<8x1xf32>
    %35 = vector.broadcast %27 : vector<8x1xf32> to vector<8x128xf32>
    %36 = arith.subf %20, %35 : vector<8x128xf32>
    %37 = vector.broadcast %34 : vector<8x1xf32> to vector<8x128xf32>
    %38 = arith.mulf %36, %37 : vector<8x128xf32>
    %c0_18 = arith.constant 0 : index
    %c0_19 = arith.constant 0 : index
    %39 = vector.load %arg7[%c0_18, %c0_19] : memref<1x128xf32, #tpu.memory_space<vmem>>, vector<1x128xf32>
    %40 = vector.broadcast %39 : vector<1x128xf32> to vector<8x128xf32>
    %41 = arith.mulf %38, %40 : vector<8x128xf32>
    %c0_20 = arith.constant 0 : index
    %c0_21 = arith.constant 0 : index
    %42 = vector.load %arg8[%c0_20, %c0_21] : memref<1x128xf32, #tpu.memory_space<vmem>>, vector<1x128xf32>
    %43 = vector.broadcast %42 : vector<1x128xf32> to vector<8x128xf32>
    %44 = arith.addf %41, %43 : vector<8x128xf32>
    %c0_22 = arith.constant 0 : index
    %c0_23 = arith.constant 0 : index
    %c0_24 = arith.constant 0 : index
    %45 = vector.load %arg9[%c0_22, %c0_23, %c0_24] : memref<1x8x128xf32, #tpu.memory_space<vmem>>, vector<1x8x128xf32>
    %46 = vector.shape_cast %45 : vector<1x8x128xf32> to vector<8x128xf32>
    %47 = vector.shape_cast %44 : vector<8x128xf32> to vector<1x8x128xf32>
    tpu.vector_store %arg9[%c0_22, %c0_23, %c0_24], %47 {strides = array<i32>} : memref<1x8x128xf32, #tpu.memory_space<vmem>>, vector<1x8x128xf32>,
    return
  }
  func.func @transform_0(%arg0: i32, %arg1: i32, %arg2: memref<32xi32, #tpu.memory_space<smem>>) -> (i32, i32) {
    %c2_i32 = arith.constant 2 : i32
    %0 = arith.muli %arg0, %c2_i32 : i32
    %1 = arith.addi %0, %arg1 : i32
    %c0_i32 = arith.constant 0 : i32
    %c0_i32_0 = arith.constant 0 : i32
    return %1, %c0_i32 : i32, i32
  }
  func.func @transform_2(%arg0: i32, %arg1: i32, %arg2: memref<32xi32, #tpu.memory_space<smem>>) -> (i32, i32) {
    %c0_i32 = arith.constant 0 : i32
    %c0_i32_0 = arith.constant 0 : i32
    return %arg1, %c0_i32 : i32, i32
  }
  func.func @transform_3(%arg0: i32, %arg1: i32, %arg2: memref<32xi32, #tpu.memory_space<smem>>) -> (i32, i32) {
    %c0_i32 = arith.constant 0 : i32
    %c0_i32_0 = arith.constant 0 : i32
    %c0_i32_1 = arith.constant 0 : i32
    return %c0_i32, %c0_i32_0 : i32, i32
  }
  func.func @transform_4(%arg0: i32, %arg1: i32, %arg2: memref<32xi32, #tpu.memory_space<smem>>) -> (i32, i32) {
    %c0_i32 = arith.constant 0 : i32
    %c0_i32_0 = arith.constant 0 : i32
    %c0_i32_1 = arith.constant 0 : i32
    return %c0_i32, %c0_i32_0 : i32, i32
  }
  func.func @transform_5(%arg0: i32, %arg1: i32, %arg2: memref<32xi32, #tpu.memory_space<smem>>) -> (i32, i32) {
    %c0_i32 = arith.constant 0 : i32
    %c0_i32_0 = arith.constant 0 : i32
    %c0_i32_1 = arith.constant 0 : i32
    return %c0_i32, %c0_i32_0 : i32, i32
  }
  func.func @transform_6(%arg0: i32, %arg1: i32, %arg2: memref<32xi32, #tpu.memory_space<smem>>) -> (i32, i32, i32) {
    %c0_i32 = arith.constant 0 : i32
    %c0_i32_0 = arith.constant 0 : i32
    return %arg0, %arg1, %c0_i32 : i32, i32, i32
  }
}

</mosaic_0001>

<bundles_post_ra>
// kernel: tpu_custom_call.1
= control target key start
LH: loop header
LB: loop body
LE: loop exit
PB: predicated region body
PF: predicated region fallthrough
CT: control target
= control target key end

     0   :  { %s983_s0 = inlined_call_operand.vmem [shape: s32[32], index: 0, kind: input, shape index: {}]   ;;  %s984_s1 = inlined_call_operand.vmem [shape: s32[32,1], index: 1, kind: input, shape index: {}]   ;;  %s985_s2 = inlined_call_operand.hbm [shape: f32[64,128], index: 2, kind: input, shape index: {}]   ;;  %s986_s3 = inlined_call_operand.vmem [shape: f32[32,128], index: 3, kind: input, shape index: {}]   ;;  %s987_s4 = inlined_call_operand.vmem [shape: f32[2,128], index: 4, kind: input, shape index: {}]   ;;  %s988_s5 = inlined_call_operand.vmem [shape: f32[1,128], index: 5, kind: input, shape index: {}]   ;;  %s989_s6 = inlined_call_operand.vmem [shape: f32[1,128], index: 6, kind: input, shape index: {}]   ;;  %s990_s7 = inlined_call_operand.hbm [shape: f32[2,16,128], index: 7, kind: output, shape index: {}]  }
   0x1   :  { %997 = sst [smem:[#allocation21_spill]] %s984_s1  ;;  %s12_s26 = sshll.u32 %s983_s0, 4  ;;  %s13_s26 = int_to_ptr.vmem [resolvable:$true] %s12_s26 }
   0x2   :  { %s605_s27 = scalar_lea.vmem %s13_s26, 16  ;;  %p610_p1 = scmp.lt.s32.totalorder %s13_s26, %s13_s26 }
   0x3   :  { %p606_p0 = scmp.ne.s32.totalorder %s13_s26, %s605_s27  ;;  %p611_p2 = scmp.lt.s32.totalorder %s605_s27, %s605_s27 }
   0x5   :  { %p612_p3 = por %p611_p2, %p610_p1 }
   0x7   :  { %p613_p4 = pnand %p612_p3, %p606_p0 }
   0x9   :  { %616 = shalt.err (!%p613_p4)  }
   0xa   :  { %s753_s28 = smov [#allocation5]  }
   0xb   :  { %15 = dma.vmem_to_smem %s13_s26, 16, %s753_s28, [#allocation4] }
   0xc   :  { %705 = dma.done.wait [#allocation4], 16 }
   0xd   :  { %706 = vsyncadd [#allocation4], 4294967280 }
   0xe   :  { %17 = sfence }
   0xf   :  { %18 = vsyncpa [#allocation7], 0 }
  0x10   :  { %20 = vsyncpa [#allocation7 + $0x1], 0  ;;  %s800_s29 = smov 0   ;;  %s802_s30 = smov 0  }
  0x11   :  { %s804_s0 = smov 0   ;;  %s806_s8 = smov 0  }
  0x12   :  { %s808_s9 = smov 0   ;;  %s810_s10 = smov 0  }
  0x13   :  { %s812_s11 = smov 0   ;;  %s814_s12 = smov 0  }
  0x14 LB: > { %998 = sst [smem:[#allocation15_spill]] %s723_s0  ;;  %s482_s13 = sadd.s32 4294967295, %s743_s12   ;;  %s743_s12 = sphi %s814_s12, %s26_s12   ;;  %s739_s11 = sphi %s812_s11, %s1015_s11   ;;  %s735_s10 = sphi %s810_s10, %s1014_s10   ;;  %s731_s9 = sphi %s808_s9, %s1013_s9   ;;  %s727_s8 = sphi %s806_s8, %s1012_s8   ;;  %s723_s0 = sphi %s804_s0, %s1011_s0   ;;  %s719_s30 = sphi %s802_s30, %s1017_s30   ;;  %s715_s29 = sphi %s800_s29, %s1016_s29  }
  0x15   : > { %999 = sst [smem:[#allocation16_spill]] %s735_s10  ;;  %s483_s14 = sadd.s32 4294967294, %s743_s12  }
  0x16   : > { %1000 = sst [smem:[#allocation17_spill]] %s739_s11  ;;  %s35_s15 = sadd.s32 1, %s735_s10 }
  0x17   : > { %p36_p5 = scmp.ge.s32.totalorder %s35_s15, 2  ;;  %s38_s16 = sadd.s32 1, %s739_s11 }
  0x18   : > { %p176_p6 = scmp.ne.s32.totalorder %s723_s0, %s719_s30  ;;  %p177_p7 = scmp.eq.s32.totalorder %s482_s13, 3 }
  0x19   : > { %s1019_s15 = smov (%p36_p5, %s35_s15), 0  ;;  %s1021_s16 = smov (!%p36_p5, %s38_s16), %s739_s11 }
  0x1a   : > { %1001 = sst [smem:[#allocation18_spill]] %s1019_s15  ;;  %s162_s17 = ssub.s32 %s735_s10, %s1019_s15 }
  0x1b   : > { %p851_p8 = por %p177_p7, %p176_p6  ;;  %p40_p9 = scmp.ge.s32.totalorder %s1021_s16, 2 }
  0x1c   : > { %p182_p10 = scmp.ne.s32.totalorder %s719_s30, %s715_s29  ;;  %p183_p11 = scmp.eq.s32.totalorder %s483_s14, 3 }
  0x1d   : > { %p488_p12 = scmp.ge.s32.totalorder %s743_s12, 1  ;;  %s1023_s16 = smov (%p40_p9, %s1021_s16), 0 }
  0x1e   : > { %1003 = sst [smem:[#allocation19_spill]] %s1023_s16  ;;  %p860_p13 = por %p183_p11, %p182_p10 }
  0x1f   : > { %p228_p0 = scmp.lt.s32.totalorder %s743_s12, 5  ;;  %s161_s20 = ssub.s32 %s739_s11, %s1023_s16 }
  0x20   : > { %s166_s21 = sadd.s32 1, %s723_s0  ;;  %s163_s22 = sor.u32 %s162_s17, %s161_s20 }
  0x21   : > { %p229_p1 = pnand %p488_p12, %p228_p0  ;;  %p164_p2 = scmp.eq.s32.totalorder %s163_s22, 0 }
  0x22   : > { %s993_s24 = sand.u32 (!%p229_p1), 1, %s719_s30   ;;  %s490_s25 = sshll.u32 (!%p229_p1), %s731_s9, 1 }
  0x23   : > { %s869_s23 = scalar_select %p164_p2, %s723_s0, %s166_s21  }
  0x24   : > { %232 = sbr.rel (%p229_p1) target bundleno = 400 (0x190), region = 40  ;;  %s875_s26 = sshll.u32 (!%p229_p1), %s993_s24, 3 }
  0x25   : > { %1005 = sst [smem:[#allocation20_spill]] %s869_s23  ;;  %s878_s27 = sadd.s32 (!%p229_p1), %s727_s8, %s490_s25 }
  0x26   : > { %p263_p3 = scmp.lt.s32.totalorder (!%p229_p1), %s878_s27, 3  ;;  %p269_p4 = scmp.lt.s32.totalorder (!%p229_p1), %s727_s8, 3 }
  0x27   : > { %s493_s28 = sshll.u32 (!%p229_p1), %s731_s9, 4  ;;  %s494_s20 = sshll.u32 (!%p229_p1), %s727_s8, 3 }
  0x28   : > { %s1006_s1 = sld [smem:[#allocation21_spill]] (!%p229_p1)  ;;  %s896_s10 = sadd.s32 (!%p229_p1), %s494_s20, %s493_s28 }
  0x29   : > { %s264_s13 = scalar_select %p263_p3, %s878_s27, 3 }
  0x2a   : > { %s270_s14 = scalar_select %p269_p4, %s727_s8, 3 }
  0x2b   : > { %s491_s17 = sshll.u32 %s264_s13, 3  ;;  %s899_s0 = smov 0  }
  0x2c   : > { %s492_s15 = sshll.u32 %s270_s14, 3 }
  0x2d   : > { %s894_s25 = scalar_lea.vmem %s986_s3, %s492_s15 }
  0x2e   : > { %s889_s16 = scalar_lea.vmem %s1006_s1, %s491_s17 }
  0x2f LB: >> { %s282_s8 = sadd.s32 %s747_s0, %s896_s10  ;;  %s290_s11 = scalar_lea.vmem [#allocation2], %s747_s0  ;;  %s747_s0 = sphi %s899_s0, %s281_s0  }
  0x30   : >> { %s283_s9 = sld [smem:[#allocation5 + %s282_s8]]  ;;  %s298_s15 = sshll.u32 %s290_s11, 4  ;;  %s299_s15 = int_to_ptr.vmem [resolvable:$true] %s298_s15 }
  0x31   : >> { %s619_s22 = scalar_lea.hbm %s985_s2, 1024 }
  0x36   : >> { %p284_p5 = scmp.gt.s32.totalorder %s283_s9, 0  ;;  %p495_p6 = scmp.lt.s32.totalorder %s283_s9, 63 }
  0x38   : >> { %s1025_s9 = smov (!%p284_p5, %s283_s9), 0 }
  0x39   : >> { %s1027_s9 = smov (!%p495_p6, %s1025_s9), 63 }
  0x3a   : >> { %s500_s24 = sshll.u32 %s1027_s9, 4 }
  0x3b   : >> { %s289_s14 = scalar_lea.hbm %s985_s2, %s500_s24 }
  0x3c   : >> { %s617_s17 = scalar_lea.hbm %s289_s14, 16  ;;  %p620_p9 = scmp.lt.s32.totalorder %s289_s14, %s985_s2 }
  0x3d   : >> { %p618_p7 = scmp.ne.s32.totalorder %s289_s14, %s617_s17  ;;  %p621_p10 = scmp.lt.s32.totalorder %s619_s22, %s617_s17 }
  0x3f   : >> { %p622_p11 = por %p621_p10, %p620_p9 }
  0x41   : >> { %p623_p12 = pnand %p622_p11, %p618_p7 }
  0x43   : >> { %626 = shalt.err (!%p623_p12)  }
  0x44   : >> { %s627_s11 = scalar_lea.vmem %s299_s15, 16  ;;  %s754_s9 = smov [#allocation2]  }
  0x45   : >> { %p628_p0 = scmp.ne.s32.totalorder %s299_s15, %s627_s11  ;;  %s629_s1 = sshll.u32 %s754_s9, 4  ;;  %s630_s1 = int_to_ptr.vmem [resolvable:$false] %s629_s1 }
  0x46   : >> { %s631_s24 = scalar_lea.vmem %s630_s1, 128  ;;  %p632_p1 = scmp.lt.s32.totalorder %s299_s15, %s630_s1 }
  0x47   : >> { %p633_p2 = scmp.lt.s32.totalorder %s631_s24, %s627_s11 }
  0x49   : >> { %p634_p3 = por %p633_p2, %p632_p1 }
  0x4b   : >> { %p635_p4 = pnand %p634_p3, %p628_p0 }
  0x4d   : >> { %638 = shalt.err (!%p635_p4)  }
  0x4e   : >> { %301 = dma.hbm_to_vmem [thread:$0]  %s289_s14, 16, %s299_s15, [#allocation3] }
  0x4f   : >> { %s281_s0 = sadd.s32 1, %s747_s0  }
  0x50   : >> { %p278_p5 = scmp.ge.s32.totalorder %s281_s0, 8  }
  0x51   : > { %s749_s23 = smov (%p278_p5), 0  }
  0x52   : > { %280 = sbr.rel (!%p278_p5) target bundleno = 47 (0x2f), region = 98 }
  0x57 LB: >> { %707 = dma.done.wait [#allocation3], 16  ;;  %s751_s23 = sphi %s749_s23, %s307_s23  }
  0x58   : >> { %708 = vsyncadd [#allocation3], 4294967280  ;;  %s307_s23 = sadd.s32 1, %s751_s23  }
  0x59   : >> { %p304_p6 = scmp.ge.s32.totalorder %s307_s23, 8  }
  0x5a   : > { %v313_v0 = vld [vmem:[%s889_s16] sm:$0xff] (%p304_p6)  ;;  %v755_v1 = vmov (%p304_p6), 0   ;;  %s507_s14 = sshll.u32 (%p304_p6), %s878_s27, 7  ;;  %s1007_s17 = scalar_lea.vmem (%p304_p6), [#allocation6], %s875_s26 }
  0x5b   : > { %306 = sbr.rel (!%p304_p6) target bundleno = 87 (0x57), region = 109  ;;  %602 = vset.pattern.permute.xlu0 (%p304_p6), %v755_v1  ;;  %vm319_vm0 = vcmp.eq.s32.totalorder (%p304_p6), %v313_v0, 1  ;;  %v311_v3 = vld [vmem:[#allocation2] sm:$0xff] (%p304_p6)  ;;  %s379_s20 = sshll.u32 (%p304_p6), %s1007_s17, 4  ;;  %s380_s20 = int_to_ptr.vmem [resolvable:$true] %s379_s20 }
  0x5c   : > { %v321_v2 = vsel (%p304_p6), %vm319_vm0, 1, %v755_v1  ;;  %v312_v4 = vld [vmem:[%s894_s25] sm:$0xff] (%p304_p6)  ;;  %s377_s8 = scalar_lea.hbm (%p304_p6), %s990_s7, %s507_s14  ;;  %s1008_s11 = smov (%p304_p6), %s1007_s17 }
  0x5d   : > { %323 = vperm.xlu0 (%p304_p6), %602, %v321_v2   ;;  %v501_v5 = vld [vmem:[%s987_s4] ss:$0 sm:$0xff] (%p304_p6)  ;;  %v502_v6 = vld [vmem:[%s987_s4 + $0x1] ss:$0 sm:$0xff] (%p304_p6)  ;;  %v331_v7 = vadd.f32 (%p304_p6), %v312_v4, %v311_v3  ;;  %s1009_s9 = sand.u32 (%p304_p6), 1, %s719_s30   ;;  %s639_s23 = scalar_lea.vmem (%p304_p6), %s380_s20, 128 }
  0x5e   : > { %v503_v21 = vld [vmem:[%s988_s5] ss:$0 sm:$0xff] (%p304_p6)  ;;  %s364_s24 = scalar_lea.sflag (%p304_p6), [#allocation7], %s1009_s9  ;;  %p640_p7 = scmp.ne.s32.totalorder (%p304_p6), %s380_s20, %s639_s23 }
  0x5f   : > { %v504_v23 = vld [vmem:[%s989_s6] ss:$0 sm:$0xff] (%p304_p6)  ;;  %s756_s1 = smov (%p304_p6), [#allocation6]  }
  0x60   : > { %p641_p9 = pnand %p640_p7, %p851_p8  ;;  %s643_s27 = sshll.u32 %s756_s1, 4  ;;  %s644_s27 = int_to_ptr.vmem [resolvable:$false] %s643_s27 }
  0x61   : > { %s645_s0 = scalar_lea.vmem %s644_s27, 256  ;;  %p646_p11 = scmp.lt.s32.totalorder %s380_s20, %s644_s27 }
  0x62   : > { %p642_p10 = pneg %p641_p9  ;;  %p647_p12 = scmp.lt.s32.totalorder %s645_s0, %s639_s23 }
  0x64   : > { %p648_p0 = por %p647_p12, %p646_p11 }
  0x66   : > { %p649_p1 = pnand %p648_p0, %p642_p10 }
  0xd8   : > { %v324_v8 = vpop.permute.xlu0 %323 }
  0xd9   : > { %vm325_vm1 = vcmp.eq.s32.totalorder %v324_v8, 1 }
  0xda   : > { %v330_v9 = vsel %vm325_vm1, %v502_v6, %v501_v5 }
  0xdb   : > { %v332_v10 = vadd.f32 %v331_v7, %v330_v9 }
  0xdd   : > { %333 = vadd.xlane.f32.xlu0 %v332_v10  ;;  %v335_v11 = vmul.f32 %v332_v10, %v332_v10 }
  0xdf   : > { %336 = vadd.xlane.f32.xlu1 %v335_v11 }
 0x166   : > { %v334_v12 = vpop.xlane.xlu0 %333 }
 0x167   : > { %v338_v13 = vmul.f32 0.0078125, %v334_v12 }
 0x168   : > { %v337_v14 = vpop.xlane.xlu1 %336 }
 0x169   : > { %v340_v15 = vmul.f32 %v338_v13, %v338_v13  ;;  %v339_v16 = vmul.f32 0.0078125, %v337_v14  ;;  %v344_v19 = vsub.f32 %v332_v10, %v338_v13 }
 0x16b   : > { %v341_v17 = vsub.f32 %v339_v16, %v340_v15 }
 0x16d   : > { %v342_v18 = vadd.f32 1e-12, %v341_v17 }
 0x16f   : > { %603 = vrsqrt.f32 %v342_v18 }
 0x17c   : > { %v604_v20 = vpop.eup %603 }
 0x17d   : > { %v345_v22 = vmul.f32 %v604_v20, %v344_v19 }
 0x17f   : > { %v353_v24 = vmul.f32 %v503_v21, %v345_v22 }
 0x181   : > { %v361_v25 = vadd.f32 %v504_v23, %v353_v24 }
 0x183   : > { %362 = vst [vmem:[%s1008_s11] sm:$0xff] %v361_v25 }
 0x184   : > { %652 = shalt.err (!%p649_p1)
}
 0x185   : > { %s653_s10 = scalar_lea.hbm %s377_s8, 128  ;;  %s657_s16 = scalar_lea.hbm %s990_s7, 512 }
 0x186   : > { %p654_p2 = scmp.ne.s32.totalorder %s377_s8, %s653_s10  ;;  %p658_p5 = scmp.lt.s32.totalorder %s377_s8, %s990_s7 }
 0x187   : > { %p659_p6 = scmp.lt.s32.totalorder %s657_s16, %s653_s10 }
 0x188   : > { %p655_p3 = pnand %p654_p2, %p851_p8 }
 0x189   : > { %p660_p7 = por %p659_p6, %p658_p5 }
 0x18a   : > { %p656_p4 = pneg %p655_p3 }
 0x18c   : > { %p661_p9 = pnand %p660_p7, %p656_p4 }
 0x18e   : > { %664 = shalt.err (!%p661_p9)
}
 0x18f   : > { %513 = dma.vmem_to_hbm [thread:$0]  (%p851_p8), %s380_s20, 128, %s377_s8, %s364_s24  }
 0x190 PF: > { %p519_p10 = scmp.ge.s32.totalorder %s743_s12, 2  ;;  %s391_s13 = sand.u32 1, %s715_s29  }
 0x191   : > { %s392_s14 = scalar_lea.sflag [#allocation7], %s391_s13 }
 0x192   : > { %p516_p11 = pnand %p519_p10, %p860_p13 }
 0x194   : > { %p517_p12 = pneg %p516_p11 }
 0x196   : > { %710 = dma.done.wait (%p517_p12), %s392_s14, 128  }
 0x197   : > { %712 = vsyncadd (%p517_p12), %s392_s14, 4294967168  ;;  %s26_s12 = sadd.s32 1, %s743_s12   ;;  %s1010_s17 = sld [smem:[#allocation15_spill]] }
 0x198   : > { %p23_p0 = scmp.ge.s32.totalorder %s26_s12, 6   ;;  %s1011_s0 = sld [smem:[#allocation20_spill]] }
 0x199   : > { %s1012_s8 = sld [smem:[#allocation16_spill]]  ;;  %s1016_s29 = smov %s719_s30 }
 0x19a   : > { %s1013_s9 = sld [smem:[#allocation17_spill]]  ;;  %25 = sbr.rel (!%p23_p0) target bundleno = 20 (0x14), region = 120 }
 0x19b   : > { %s1014_s10 = sld [smem:[#allocation18_spill]] }
 0x19c   : > { %s1015_s11 = sld [smem:[#allocation19_spill]] }
 0x19d   : > { %s1017_s30 = smov %s1010_s17 }
 0x19f   :  { %397 = vsyncpa [#allocation7], 1 }
 0x1a0   :  { %399 = vsyncpa [#allocation7 + $0x1], 1 }
 0x1a1   :  { %400 = vsyncmov [#allocation3] }
 0x1a4   :  { %s401_s18 = vpop.sfrf %400 }
 0x1a5   :  { %p510_p8 = scmp.ne.s32.totalorder %s401_s18, 0 }
 0x1a7   :  { %405 = shalt.err (%p510_p8)  }

</bundles_post_ra>
